<compile_context>
chip_gen: v6e
topology: v6e:2x2x1
jax: 0.10.0
libtpu: 0.0.40
codegen_flags: <defaults>
</compile_context>

<pallas_src>
import math

import jax
import jax.numpy as jnp
from jax.experimental import pallas as pl
from jax.experimental.pallas import tpu as pltpu


# ------------------------------ kernels ------------------------------------


def _mm_kernel(a_ref, b_ref, o_ref, acc_ref):
    """out[i,j] = sum_k a[i,k] @ b[k,j]; f32 accumulator in VMEM scratch."""
    k = pl.program_id(2)

    @pl.when(k == 0)
    def _():
        acc_ref[...] = jnp.zeros_like(acc_ref)

    acc_ref[...] += jnp.dot(a_ref[...], b_ref[...],
                            preferred_element_type=jnp.float32)

    @pl.when(k == pl.num_programs(2) - 1)
    def _():
        o_ref[...] = acc_ref[...].astype(o_ref.dtype)


def _mm_bias_kernel(a_ref, b_ref, bias_ref, o_ref, acc_ref):
    """Same as _mm_kernel but adds a (1, tn) bias row once, at writeback."""
    k = pl.program_id(2)

    @pl.when(k == 0)
    def _():
        acc_ref[...] = jnp.zeros_like(acc_ref)

    acc_ref[...] += jnp.dot(a_ref[...], b_ref[...],
                            preferred_element_type=jnp.float32)

    @pl.when(k == pl.num_programs(2) - 1)
    def _():
        o_ref[...] = (acc_ref[...] + bias_ref[...]).astype(o_ref.dtype)


# ------------------------------ wrappers ------------------------------------


def _round_up(x, m):
    return ((x + m - 1) // m) * m


def _pick_tile(dim, target, align):
    """Return (tile, padded_dim) with tile % align == 0 and padded % tile == 0."""
    tile = min(target, _round_up(dim, align))
    return tile, _round_up(dim, tile)


def _tile_targets():
    """128-aligned tiles on v5e (4x128x128 MXU), 256-aligned elsewhere."""
    try:
        kind = jax.devices()[0].device_kind.lower()
    except Exception:  # pragma: no cover - defensive
        kind = ""
    if "v5" in kind:
        return 128, 128, 512
    return 256, 256, 512


def _tiled_matmul(a, b, bias_row=None):
    """Lane-dense tiled matmul: (M, K) @ (K, N) [+ bias_row broadcast over rows]."""
    M, K = a.shape
    Kb, N = b.shape
    assert K == Kb, (a.shape, b.shape)

    tm_t, tn_t, tk_t = _tile_targets()
    tm, Mp = _pick_tile(M, tm_t, 8)      # sublane-aligned M tile
    tn, Np = _pick_tile(N, tn_t, 128)    # lane-dense output tile (>=128)
    tk, Kp = _pick_tile(K, tk_t, 128)    # lane-aligned contraction tile

    a_p = a if (Mp == M and Kp == K) else jnp.pad(a, ((0, Mp - M), (0, Kp - K)))
    b_p = b if (Kp == K and Np == N) else jnp.pad(b, ((0, Kp - K), (0, Np - N)))

    grid = (Mp // tm, Np // tn, Kp // tk)
    a_spec = pl.BlockSpec((tm, tk), lambda i, j, k: (i, k))
    b_spec = pl.BlockSpec((tk, tn), lambda i, j, k: (k, j))
    o_spec = pl.BlockSpec((tm, tn), lambda i, j, k: (i, j))
    scratch = [pltpu.VMEM((tm, tn), jnp.float32)]
    cparams = pltpu.CompilerParams(
        dimension_semantics=("parallel", "parallel", "arbitrary"))

    if bias_row is None:
        out_p = pl.pallas_call(
            _mm_kernel,
            out_shape=jax.ShapeDtypeStruct((Mp, Np), a.dtype),
            grid_spec=pltpu.PrefetchScalarGridSpec(
                num_scalar_prefetch=0,
                grid=grid,
                in_specs=[a_spec, b_spec],
                out_specs=o_spec,
                scratch_shapes=scratch),
            compiler_params=cparams,
        )(a_p, b_p)
    else:
        bias2d = bias_row.reshape(1, N)
        bias_p = bias2d if Np == N else jnp.pad(bias2d, ((0, 0), (0, Np - N)))
        bias_spec = pl.BlockSpec((1, tn), lambda i, j, k: (0, j))
        out_p = pl.pallas_call(
            _mm_bias_kernel,
            out_shape=jax.ShapeDtypeStruct((Mp, Np), a.dtype),
            grid_spec=pltpu.PrefetchScalarGridSpec(
                num_scalar_prefetch=0,
                grid=grid,
                in_specs=[a_spec, b_spec, bias_spec],
                out_specs=o_spec,
                scratch_shapes=scratch),
            compiler_params=cparams,
        )(a_p, b_p, bias_p)

    if Mp == M and Np == N:
        return out_p
    return out_p[:M, :N]


def graph_convolution(inputs, adj, weight, bias=None):
    """inputs: (B, N, Fin), adj: (N, N), weight: (Fin, Fout), bias: (1,1,Fout)|None."""
    B, N, Fin = inputs.shape
    Fout = weight.shape[1]
    bias_row = None if bias is None else bias.reshape(-1)  # (Fout,)

    if Fout <= Fin:
        # Order 1: support = X @ W, then adj @ support (adj FLOPs scale with Fout).
        x2d = inputs.reshape(B * N, Fin)
        support = _tiled_matmul(x2d, weight)                          # (B*N, Fout)
        # Fold batch into the lane dim for the adj stage: (N, B*Fout) slab.
        s_t = support.reshape(B, N, Fout).transpose(1, 0, 2).reshape(N, B * Fout)
        bias_t = None if bias_row is None else jnp.tile(bias_row, (B,))
        out_t = _tiled_matmul(adj, s_t, bias_t)                       # (N, B*Fout)
        out = out_t.reshape(N, B, Fout).transpose(1, 0, 2)            # (B, N, Fout)
    else:
        # Order 2: tmp = adj @ X, then tmp @ W (adj FLOPs scale with Fin).
        x_t = inputs.transpose(1, 0, 2).reshape(N, B * Fin)           # (N, B*Fin)
        tmp_t = _tiled_matmul(adj, x_t)                               # (N, B*Fin)
        tmp = tmp_t.reshape(N, B, Fin).transpose(1, 0, 2).reshape(B * N, Fin)
        out2d = _tiled_matmul(tmp, weight, bias_row)                  # (B*N, Fout)
        out = out2d.reshape(B, N, Fout)
    return out


# ------------------------------ test ---------------------------------------


if __name__ == "__main__":
    B, N, Fin, Fout = 2, 8, 16, 32

    key = jax.random.PRNGKey(0)
    k_x, k_adj, k_w, k_b = jax.random.split(key, 4)

    # Parameter init mirroring reset_parameters(): uniform(-stdv, stdv),
    # stdv = 1/sqrt(out_features).
    stdv = 1.0 / math.sqrt(Fout)
    weight = jax.random.uniform(k_w, (Fin, Fout), jnp.float32,
                                minval=-stdv, maxval=stdv)
    bias = jax.random.uniform(k_b, (1, 1, Fout), jnp.float32,
                              minval=-stdv, maxval=stdv)

    inputs = jax.random.normal(k_x, (B, N, Fin), jnp.float32)
    adj = jax.random.uniform(k_adj, (N, N), jnp.float32)

    # Primary check (Fout > Fin path).
    out = jax.block_until_ready(graph_convolution(inputs, adj, weight, bias))
    ref = jnp.matmul(adj, jnp.matmul(inputs, weight)) + bias
    assert out.shape == (B, N, Fout)
    assert jnp.allclose(out, ref, atol=1e-4, rtol=1e-4)

    # Also exercise the Fout <= Fin ordering branch.
    x2 = ref.astype(jnp.float32)          # (B, N, 32)
    w2 = jnp.transpose(weight)            # (32, 16) -> Fout2=16 <= Fin2=32
    b2 = bias[..., :16] * 0.5             # (1, 1, 16)
    out2 = jax.block_until_ready(graph_convolution(x2, adj, w2, b2))
    ref2 = jnp.matmul(adj, jnp.matmul(x2, w2)) + b2
    assert jnp.allclose(out2, ref2, atol=1e-4, rtol=1e-4)

    print("KERNEL_OK")
</pallas_src>

<mosaic_0001>
module attributes {stable_mosaic.version = 11 : i64} {
  func.func @_mm_kernel(%arg0: i32, %arg1: i32, %arg2: i32, %arg3: memref<8x128xf32, #tpu.memory_space<vmem>>, %arg4: memref<128x128xf32, #tpu.memory_space<vmem>>, %arg5: memref<8x128xf32, #tpu.memory_space<vmem>>, %arg6: memref<8x128xf32, #tpu.memory_space<vmem>>) attributes {dimension_semantics = [#tpu.dimension_semantics<parallel>, #tpu.dimension_semantics<parallel>, #tpu.dimension_semantics<arbitrary>], iteration_bounds = array<i64: 1, 1, 1>, scalar_prefetch = 0 : i64, scratch_operands = 1 : i64, tpu.core_type = #tpu.core_type<tc>, window_params = [{transform_indices = @transform_0, window_bounds = array<i64: 8, 128>}, {transform_indices = @transform_1, window_bounds = array<i64: 128, 128>}, {transform_indices = @transform_2, window_bounds = array<i64: 8, 128>}]} {
    %c0_i32 = arith.constant 0 : i32
    %0 = arith.cmpi eq, %arg2, %c0_i32 : i32
    %1 = arith.extui %0 : i1 to i32
    %c0_i32_0 = arith.constant 0 : i32
    %2 = arith.cmpi ne, %1, %c0_i32_0 : i32
    scf.if %2 {
      %cst_10 = arith.constant 0.000000e+00 : f32
      %12 = vector.broadcast %cst_10 : f32 to vector<8x128xf32>
      %c0_11 = arith.constant 0 : index
      %c0_12 = arith.constant 0 : index
      %13 = vector.load %arg6[%c0_11, %c0_12] : memref<8x128xf32, #tpu.memory_space<vmem>>, vector<8x128xf32>
      tpu.vector_store %arg6[%c0_11, %c0_12], %12 {strides = array<i32>} : memref<8x128xf32, #tpu.memory_space<vmem>>, vector<8x128xf32>,
    } else {
    }
    %c0 = arith.constant 0 : index
    %c0_1 = arith.constant 0 : index
    %3 = vector.load %arg6[%c0, %c0_1] : memref<8x128xf32, #tpu.memory_space<vmem>>, vector<8x128xf32>
    %c0_2 = arith.constant 0 : index
    %c0_3 = arith.constant 0 : index
    %4 = vector.load %arg3[%c0_2, %c0_3] : memref<8x128xf32, #tpu.memory_space<vmem>>, vector<8x128xf32>
    %c0_4 = arith.constant 0 : index
    %c0_5 = arith.constant 0 : index
    %5 = vector.load %arg4[%c0_4, %c0_5] : memref<128x128xf32, #tpu.memory_space<vmem>>, vector<128x128xf32>
    %cst = arith.constant dense<0.000000e+00> : vector<8x128xf32>
    %6 = tpu.matmul %4, %5, %cst {dimension_numbers = #tpu.dot_dimension_numbers<[1], [0], [0], [1], [0, 0, 1, 1], [], []>} : vector<8x128xf32>, vector<128x128xf32>, vector<8x128xf32> -> vector<8x128xf32>
    %7 = arith.addf %3, %6 : vector<8x128xf32>
    %c0_6 = arith.constant 0 : index
    %c0_7 = arith.constant 0 : index
    %8 = vector.load %arg6[%c0_6, %c0_7] : memref<8x128xf32, #tpu.memory_space<vmem>>, vector<8x128xf32>
    tpu.vector_store %arg6[%c0_6, %c0_7], %7 {strides = array<i32>} : memref<8x128xf32, #tpu.memory_space<vmem>>, vector<8x128xf32>,
    %c0_i32_8 = arith.constant 0 : i32
    %9 = arith.cmpi eq, %arg2, %c0_i32_8 : i32
    %10 = arith.extui %9 : i1 to i32
    %c0_i32_9 = arith.constant 0 : i32
    %11 = arith.cmpi ne, %10, %c0_i32_9 : i32
    scf.if %11 {
      %c0_10 = arith.constant 0 : index
      %c0_11 = arith.constant 0 : index
      %12 = vector.load %arg6[%c0_10, %c0_11] : memref<8x128xf32, #tpu.memory_space<vmem>>, vector<8x128xf32>
      %c0_12 = arith.constant 0 : index
      %c0_13 = arith.constant 0 : index
      %13 = vector.load %arg5[%c0_12, %c0_13] : memref<8x128xf32, #tpu.memory_space<vmem>>, vector<8x128xf32>
      tpu.vector_store %arg5[%c0_12, %c0_13], %12 {strides = array<i32>} : memref<8x128xf32, #tpu.memory_space<vmem>>, vector<8x128xf32>,
    } else {
    }
    return
  }
  func.func @transform_0(%arg0: i32, %arg1: i32, %arg2: i32) -> (i32, i32) {
    %c0_i32 = arith.constant 0 : i32
    return %arg0, %arg2 : i32, i32
  }
  func.func @transform_1(%arg0: i32, %arg1: i32, %arg2: i32) -> (i32, i32) {
    %c0_i32 = arith.constant 0 : i32
    return %arg2, %arg1 : i32, i32
  }
  func.func @transform_2(%arg0: i32, %arg1: i32, %arg2: i32) -> (i32, i32) {
    %c0_i32 = arith.constant 0 : i32
    return %arg0, %arg1 : i32, i32
  }
}

</mosaic_0001>

<bundles_post_ra>
// kernel: tpu_custom_call.1
= control target key start
LH: loop header
LB: loop body
LE: loop exit
PB: predicated region body
PF: predicated region fallthrough
CT: control target
= control target key end

     0   :  { %7 = vsyncpa [#allocation4], 0  ;;  %s310_s0 = inlined_call_operand.hbm [shape: f32[8,128], index: 0, kind: input, shape index: {}]   ;;  %s311_s1 = inlined_call_operand.hbm [shape: f32[128,128], index: 1, kind: input, shape index: {}]   ;;  %s312_s2 = inlined_call_operand.hbm [shape: f32[8,128], index: 2, kind: output, shape index: {}]  }
   0x1   :  { %8 = vsyncpa [#allocation7], 0 }
   0x2   :  { %9 = vsyncpa [#allocation5], 0  ;;  %s279_s9 = smov [#allocation3]   ;;  %s280_s11 = smov [#allocation6]  }
   0x3   :  { %s16_s10 = sshll.u32 %s279_s9, 4  ;;  %s25_s12 = sshll.u32 %s280_s11, 4  ;;  %s17_s10 = int_to_ptr.vmem [resolvable:$true] %s16_s10  ;;  %s26_s12 = int_to_ptr.vmem [resolvable:$true] %s25_s12 }
   0x4   :  { %s221_s13 = scalar_lea.vmem %s17_s10, 128  ;;  %p226_p1 = scmp.lt.s32.totalorder %s17_s10, %s17_s10 }
   0x5   :  { %p222_p0 = scmp.ne.s32.totalorder %s17_s10, %s221_s13  ;;  %p227_p2 = scmp.lt.s32.totalorder %s221_s13, %s221_s13 }
   0x7   :  { %p228_p3 = por %p227_p2, %p226_p1 }
   0x9   :  { %p229_p4 = pnand %p228_p3, %p222_p0 }
   0xb   :  { %232 = shalt.err (!%p229_p4)
}
   0xc   :  { %19 = dma.hbm_to_vmem [thread:$0]  %s310_s0, 128, %s17_s10, [#allocation4]  }
   0xd   :  { %s241_s16 = scalar_lea.vmem %s26_s12, 2048  ;;  %p246_p6 = scmp.lt.s32.totalorder %s26_s12, %s26_s12 }
   0xe   :  { %p242_p5 = scmp.ne.s32.totalorder %s26_s12, %s241_s16  ;;  %p247_p7 = scmp.lt.s32.totalorder %s241_s16, %s241_s16 }
  0x10   :  { %p248_p8 = por %p247_p7, %p246_p6 }
  0x12   :  { %p249_p9 = pnand %p248_p8, %p242_p5 }
  0x14   :  { %252 = shalt.err (!%p249_p9)
}
  0x15   :  { %s281_s17 = smov 128   ;;  %s282_s18 = smov 8  }
  0x16   :  { %31 = dma.hbm_to_vmem [thread:$0]  %s311_s1, 2048, %s26_s12, [#allocation7], %s281_s17, %s281_s17, %s282_s18  }
  0x17   :  { %273 = dma.done.wait [#allocation4], 128  }
  0x18   :  { %274 = vsyncadd [#allocation4], 4294967168 }
  0x19   :  { %275 = dma.done.wait [#allocation7], 2048  }
  0x1a   :  { %276 = vsyncadd [#allocation7], 4294965248  ;;  %v283_v0 = vmov 0.0   ;;  %vm284_vm0 = vmmov 0   ;;  %v60_v1 = vld [vmem:[#allocation6 + $0x78] sm:$0xff]  ;;  %v59_v2 = vld [vmem:[#allocation6 + $0x70] sm:$0xff] }
  0x1b   :  { %171 = vmatprep.subr.mxu0 %v283_v0  ;;  %203 = vmatprep.mubr.msk.f32.mxu0 %vm284_vm0, %v283_v0  ;;  %v58_v3 = vld [vmem:[#allocation6 + $0x68] sm:$0xff]  ;;  %v57_v4 = vld [vmem:[#allocation6 + $0x60] sm:$0xff]  ;;  %v56_v5 = vld [vmem:[#allocation6 + $0x58] sm:$0xff]  ;;  %s285_s0 = smov [#allocation8]  }
  0x1c   :  { %172 = vmatpush3.msra.mxu0 %v60_v1  ;;  %v55_v6 = vld [vmem:[#allocation6 + $0x50] sm:$0xff]  ;;  %v54_v7 = vld [vmem:[#allocation6 + $0x48] sm:$0xff]  ;;  %v53_v8 = vld [vmem:[#allocation6 + $0x40] sm:$0xff]  ;;  %s144_s1 = sshll.u32 %s285_s0, 4  ;;  %s145_s1 = int_to_ptr.vmem [resolvable:$true] %s144_s1 }
  0x1d   :  { %173 = vmatprep.subr.mxu0 %v283_v0  ;;  %v52_v9 = vld [vmem:[#allocation6 + $0x38] sm:$0xff]  ;;  %v51_v10 = vld [vmem:[#allocation6 + $0x30] sm:$0xff]  ;;  %v50_v11 = vld [vmem:[#allocation6 + $0x28] sm:$0xff]  ;;  %s253_s21 = scalar_lea.vmem %s145_s1, 128  ;;  %p258_p11 = scmp.lt.s32.totalorder %s145_s1, %s145_s1 }
  0x1e   :  { %174 = vmatpush3.msra.mxu0 %v59_v2  ;;  %v49_v12 = vld [vmem:[#allocation6 + $0x20] sm:$0xff]  ;;  %v48_v13 = vld [vmem:[#allocation6 + $0x18] sm:$0xff]  ;;  %v47_v14 = vld [vmem:[#allocation6 + $0x10] sm:$0xff]  ;;  %p254_p10 = scmp.ne.s32.totalorder %s145_s1, %s253_s21  ;;  %p259_p12 = scmp.lt.s32.totalorder %s253_s21, %s253_s21 }
  0x1f   :  { %175 = vmatprep.subr.mxu0 %v283_v0  ;;  %v46_v15 = vld [vmem:[#allocation6 + $0x8] sm:$0xff]  ;;  %v45_v16 = vld [vmem:[#allocation6] sm:$0xff]  ;;  %v44_v17 = vld [vmem:[#allocation3] sm:$0xff] }
  0x20   :  { %176 = vmatpush3.msra.mxu0 %v58_v3  ;;  %p260_p13 = por %p259_p12, %p258_p11 }
  0x21   :  { %177 = vmatprep.subr.mxu0 %v283_v0 }
  0x22   :  { %178 = vmatpush3.msra.mxu0 %v57_v4  ;;  %p261_p0 = pnand %p260_p13, %p254_p10 }
  0x23   :  { %179 = vmatprep.subr.mxu0 %v283_v0 }
  0x24   :  { %180 = vmatpush3.msra.mxu0 %v56_v5 }
  0x25   :  { %181 = vmatprep.subr.mxu0 %v283_v0 }
  0x26   :  { %182 = vmatpush3.msra.mxu0 %v55_v6 }
  0x27   :  { %183 = vmatprep.subr.mxu0 %v283_v0 }
  0x28   :  { %184 = vmatpush3.msra.mxu0 %v54_v7 }
  0x29   :  { %185 = vmatprep.subr.mxu0 %v283_v0 }
  0x2a   :  { %186 = vmatpush3.msra.mxu0 %v53_v8 }
  0x2b   :  { %187 = vmatprep.subr.mxu0 %v283_v0 }
  0x2c   :  { %188 = vmatpush3.msra.mxu0 %v52_v9 }
  0x2d   :  { %189 = vmatprep.subr.mxu0 %v283_v0 }
  0x2e   :  { %190 = vmatpush3.msra.mxu0 %v51_v10 }
  0x2f   :  { %191 = vmatprep.subr.mxu0 %v283_v0 }
  0x30   :  { %192 = vmatpush3.msra.mxu0 %v50_v11 }
  0x31   :  { %193 = vmatprep.subr.mxu0 %v283_v0 }
  0x32   :  { %194 = vmatpush3.msra.mxu0 %v49_v12 }
  0x33   :  { %195 = vmatprep.subr.mxu0 %v283_v0 }
  0x34   :  { %196 = vmatpush3.msra.mxu0 %v48_v13 }
  0x35   :  { %197 = vmatprep.subr.mxu0 %v283_v0 }
  0x36   :  { %198 = vmatpush3.msra.mxu0 %v47_v14 }
  0x37   :  { %199 = vmatprep.subr.mxu0 %v283_v0 }
  0x38   :  { %200 = vmatpush3.msra.mxu0 %v46_v15 }
  0x39   :  { %201 = vmatprep.subr.mxu0 %v283_v0 }
  0x3a   :  { %202 = vmatpush3.msra.mxu0 %v45_v16 }
  0x3b   :  { %204 = vmatmul.mubr.f32.vlgmr.msra.gmra.mxu0 %v44_v17 }
  0xfb   :  { %v127_v18 = vpop.f32.mrf.mxu0 }
  0xfc   :  { %137 = vst [vmem:[#allocation8] sm:$0xff] %v127_v18 }
  0xfd   :  { %v205_v19 = vpop.f32.mrf.mxu0 }
  0xfe   :  { %264 = shalt.err (!%p261_p0)
}
  0xff   :  { %147 = dma.vmem_to_hbm [thread:$0]  %s145_s1, 128, %s312_s2, [#allocation5]  }
 0x100   :  { %277 = dma.done.wait [#allocation5], 128  }
 0x101   :  { %278 = vsyncadd [#allocation5], 4294967168 }
 0x102   :  { %151 = vsyncpa [#allocation4], 1 }
 0x103   :  { %152 = vsyncpa [#allocation7], 1 }
 0x104   :  { %153 = vsyncpa [#allocation5], 1 }

</bundles_post_ra>
